<compile_context>
chip_gen: v6e
topology: v6e:2x2x1
jax: 0.10.0
libtpu: 0.0.40
codegen_flags: <defaults>
</compile_context>

<pallas_src>
import jax
import jax.numpy as jnp
from jax import lax
from jax.experimental import pallas as pl
from jax.experimental.pallas import tpu as pltpu

_LANE = 128


def _round_up(x, m):
    return ((x + m - 1) // m) * m


def _sublane(dtype):
    """Minimum sublane multiple for the second-minor dim of a tiled block."""
    itemsize = jnp.dtype(dtype).itemsize
    return max(8, 32 // max(1, itemsize))     # f32 -> 8, bf16 -> 16, int8/fp8 -> 32


def _make_kernel(r_tile, hw_tile, lane_acc, hw_total, num_k):
    """Build the pooling kernel for a fixed tiling (all args are Python ints)."""
    n_full_steady = hw_tile // lane_acc              # full lane_acc-wide chunks / tile
    rem_steady = hw_tile - n_full_steady * lane_acc  # nonzero only when num_k == 1

    last_base = (num_k - 1) * hw_tile                # static global offset of last tile
    n_valid_last = hw_total - last_base              # valid elements in the last tile
    n_full_last = n_valid_last // lane_acc
    rem_last = n_valid_last - n_full_last * lane_acc
    ragged = (num_k > 1) and (n_valid_last < hw_tile)
    inv_hw = 1.0 / float(hw_total)

    def fold(x_ref, max_acc, sum_acc, n_chunks, tail):
        # Steady-state fold: pure VPU max/add into f32 VMEM accumulators.
        # No masks, no iota -- chunk boundaries are static.
        if n_chunks > 4:
            def body(j, carry):
                start = pl.multiple_of(j * lane_acc, lane_acc)
                c = x_ref[:, pl.ds(start, lane_acc)].astype(jnp.float32)
                max_acc[...] = jnp.maximum(max_acc[...], c)
                sum_acc[...] = sum_acc[...] + c
                return carry
            lax.fori_loop(0, n_chunks, body, 0, unroll=4)
        else:
            for j in range(n_chunks):
                c = x_ref[:, j * lane_acc:(j + 1) * lane_acc].astype(jnp.float32)
                max_acc[...] = jnp.maximum(max_acc[...], c)
                sum_acc[...] = sum_acc[...] + c
        if tail:
            # Static partial chunk at the global end of HW (cold path, last k only).
            c0 = n_chunks * lane_acc
            c = x_ref[:, c0:c0 + tail].astype(jnp.float32)
            max_acc[:, :tail] = jnp.maximum(max_acc[:, :tail], c)
            sum_acc[:, :tail] = sum_acc[:, :tail] + c

    def kernel(x_ref, out_ref, max_acc, sum_acc):
        k = pl.program_id(1)

        @pl.when(k == 0)
        def _init():
            max_acc[...] = jnp.full(max_acc.shape, -jnp.inf, dtype=max_acc.dtype)
            sum_acc[...] = jnp.zeros(sum_acc.shape, dtype=sum_acc.dtype)

        if ragged:
            # Unmasked steady state; the statically-smaller fold runs only on the
            # final k step (the only tile that can contain padded columns).
            @pl.when(k < num_k - 1)
            def _steady():
                fold(x_ref, max_acc, sum_acc, n_full_steady, 0)

            @pl.when(k == num_k - 1)
            def _tail():
                fold(x_ref, max_acc, sum_acc, n_full_last, rem_last)
        else:
            fold(x_ref, max_acc, sum_acc, n_full_steady, rem_steady)

        @pl.when(k == num_k - 1)
        def _finalize():
            # Single deferred cross-lane (XLU) reduce per row block; fused output:
            # lane 0 = max, lane 1 = mean (true H*W divisor).
            mx = jnp.max(max_acc[...], axis=-1, keepdims=True)             # (r_tile, 1)
            mean = jnp.sum(sum_acc[...], axis=-1, keepdims=True) * inv_hw  # (r_tile, 1)
            out_ref[:, 0:1] = mx.astype(out_ref.dtype)
            out_ref[:, 1:2] = mean.astype(out_ref.dtype)

    return kernel


def adaptive_concat_pool2d(x, *, target_block_bytes=8 * 1024 * 1024,
                           max_lane_chunks=16,
                           scratch_budget_bytes=8 * 1024 * 1024):
    """x: (N, C, H, W) float -> (N, 2C, 1, 1), matching torch.cat([mp(x), ap(x)], 1)."""
    N, C, H, W = x.shape
    R, HW = N * C, H * W
    itemsize = jnp.dtype(x.dtype).itemsize
    sub = _sublane(x.dtype)

    # ---- HW (lane / reduction) tile: multiple of 128 or full extent. ----
    max_hw_tile = min(
        max_lane_chunks * _LANE,
        max(_LANE, (target_block_bytes // (sub * itemsize)) // _LANE * _LANE))
    if HW <= max_hw_tile:
        hw_tile = HW                               # full extent, never padded
        num_k = 1
    else:
        num_k = pl.cdiv(HW, max_hw_tile)
        hw_tile = min(max_hw_tile, _round_up(pl.cdiv(HW, num_k), _LANE))
        num_k = pl.cdiv(HW, hw_tile)
    lane_acc = min(_LANE, hw_tile)

    # ---- Row (sublane / parallel) tile: dtype-aware multiple, fill the budget,
    #      but aim for >= 2 row blocks so v7x's two TensorCores both get work. ----
    r_cap_bytes = max(sub, (target_block_bytes // (hw_tile * itemsize)) // sub * sub)
    r_cap_scr = max(sub, (scratch_budget_bytes // (lane_acc * 8)) // sub * sub)
    r_cap = min(r_cap_bytes, r_cap_scr)
    if R <= sub:
        r_tile = R                                 # full extent
    else:
        r_tile = min(r_cap, _round_up(pl.cdiv(R, 2), sub))
    num_r = pl.cdiv(R, r_tile)

    kernel = _make_kernel(r_tile, hw_tile, lane_acc, HW, num_k)

    x2 = x.reshape(R, HW)                          # free reshape for contiguous NCHW

    block_bytes = r_tile * hw_tile * itemsize
    scratch_bytes = r_tile * lane_acc * 4 * 2      # two f32 accumulators
    out_bytes = r_tile * 2 * itemsize
    vmem_limit = int(min(56 * 1024 * 1024,
                         max(32 * 1024 * 1024,
                             2 * block_bytes + scratch_bytes + 2 * out_bytes
                             + 8 * 1024 * 1024)))

    out = pl.pallas_call(
        kernel,
        out_shape=jax.ShapeDtypeStruct((R, 2), x.dtype),
        grid_spec=pltpu.PrefetchScalarGridSpec(
            num_scalar_prefetch=0,
            grid=(num_r, num_k),
            in_specs=[pl.BlockSpec((r_tile, hw_tile), lambda i, k: (i, k))],
            out_specs=pl.BlockSpec((r_tile, 2), lambda i, k: (i, 0)),
            scratch_shapes=[pltpu.VMEM((r_tile, lane_acc), jnp.float32),   # running max
                            pltpu.VMEM((r_tile, lane_acc), jnp.float32)],  # running sum
        ),
        compiler_params=pltpu.CompilerParams(
            dimension_semantics=("parallel", "arbitrary"),
            vmem_limit_bytes=vmem_limit),
        cost_estimate=pl.CostEstimate(
            flops=2 * R * HW,
            transcendentals=0,
            bytes_accessed=R * HW * itemsize + 2 * R * itemsize),
    )(x2)

    mx = out[:, 0].reshape(N, C)
    avg = out[:, 1].reshape(N, C)
    # Channel concat on tiny (N, 2C) result; identical layout to torch.cat(dim=1).
    return jnp.concatenate([mx, avg], axis=1).reshape(N, 2 * C, 1, 1)


def _reference(x):
    N, C, H, W = x.shape
    xf = x.astype(jnp.float32)
    mx = jnp.max(xf, axis=(2, 3))
    avg = jnp.mean(xf, axis=(2, 3))
    return jnp.concatenate([mx, avg], axis=1).reshape(N, 2 * C, 1, 1)


def _check(x, atol=1e-5, rtol=1e-5, **kw):
    N, C, H, W = x.shape
    out = jax.block_until_ready(adaptive_concat_pool2d(x, **kw))
    ref = _reference(x)
    assert out.shape == (N, 2 * C, 1, 1), out.shape
    assert jnp.allclose(out.astype(jnp.float32), ref, atol=atol, rtol=rtol), \
        "mismatch vs reference"
    return out


if __name__ == "__main__":
    key = jax.random.PRNGKey(0)

    # Main check: the module's canonical small shape.
    x = jax.random.normal(key, (2, 4, 16, 16), dtype=jnp.float32)
    _check(x)

    # H*W not a multiple of 128 (static partial-chunk path, single k step).
    x2 = jax.random.normal(jax.random.PRNGKey(1), (2, 4, 13, 13), dtype=jnp.float32)
    _check(x2)

    # Force multi-step HW tiling with a ragged final tile (accumulator across k,
    # unmasked steady state + static tail fold).
    _check(x2, max_lane_chunks=1)

    # >= 2 row blocks ("parallel" axis) + multi-k ragged reduction together.
    x3 = jax.random.normal(jax.random.PRNGKey(2), (4, 64, 17, 19), dtype=jnp.float32)
    _check(x3)
    _check(x3, max_lane_chunks=1)

    # bf16 input exercises the dtype-aware sublane multiple (16) and f32 accumulation.
    x4 = jax.random.normal(jax.random.PRNGKey(3), (2, 32, 9, 9)).astype(jnp.bfloat16)
    _check(x4, atol=2e-2, rtol=2e-2)

    print("KERNEL_OK")
</pallas_src>

<mosaic_0001>
module attributes {stable_mosaic.version = 11 : i64} {
  func.func @kernel(%arg0: i32, %arg1: i32, %arg2: memref<8x256xf32, #tpu.memory_space<vmem>>, %arg3: memref<8x2xf32, #tpu.memory_space<vmem>>, %arg4: memref<8x128xf32, #tpu.memory_space<vmem>>, %arg5: memref<8x128xf32, #tpu.memory_space<vmem>>) attributes {dimension_semantics = [#tpu.dimension_semantics<parallel>, #tpu.dimension_semantics<arbitrary>], iteration_bounds = array<i64: 1, 1>, scalar_prefetch = 0 : i64, scratch_operands = 2 : i64, tpu.core_type = #tpu.core_type<tc>, window_params = [{transform_indices = @transform_0, window_bounds = array<i64: 8, 256>}, {transform_indices = @transform_1, window_bounds = array<i64: 8, 2>}]} {
    %c0_i32 = arith.constant 0 : i32
    %0 = arith.cmpi eq, %arg1, %c0_i32 : i32
    %1 = arith.extui %0 : i1 to i32
    %c0_i32_0 = arith.constant 0 : i32
    %2 = arith.cmpi ne, %1, %c0_i32_0 : i32
    scf.if %2 {
      %cst = arith.constant 0xFF800000 : f32
      %20 = vector.broadcast %cst : f32 to vector<8x128xf32>
      %c0_21 = arith.constant 0 : index
      %c0_22 = arith.constant 0 : index
      %21 = vector.load %arg4[%c0_21, %c0_22] : memref<8x128xf32, #tpu.memory_space<vmem>>, vector<8x128xf32>
      tpu.vector_store %arg4[%c0_21, %c0_22], %20 {strides = array<i32>} : memref<8x128xf32, #tpu.memory_space<vmem>>, vector<8x128xf32>,
      %cst_23 = arith.constant 0.000000e+00 : f32
      %22 = vector.broadcast %cst_23 : f32 to vector<8x128xf32>
      %c0_24 = arith.constant 0 : index
      %c0_25 = arith.constant 0 : index
      %23 = vector.load %arg5[%c0_24, %c0_25] : memref<8x128xf32, #tpu.memory_space<vmem>>, vector<8x128xf32>
      tpu.vector_store %arg5[%c0_24, %c0_25], %22 {strides = array<i32>} : memref<8x128xf32, #tpu.memory_space<vmem>>, vector<8x128xf32>,
    } else {
    }
    %c0 = arith.constant 0 : index
    %c0_1 = arith.constant 0 : index
    %3 = vector.load %arg2[%c0, %c0_1] : memref<8x256xf32, #tpu.memory_space<vmem>>, vector<8x128xf32>
    %c0_2 = arith.constant 0 : index
    %c0_3 = arith.constant 0 : index
    %4 = vector.load %arg4[%c0_2, %c0_3] : memref<8x128xf32, #tpu.memory_space<vmem>>, vector<8x128xf32>
    %5 = arith.maximumf %4, %3 : vector<8x128xf32>
    %c0_4 = arith.constant 0 : index
    %c0_5 = arith.constant 0 : index
    %6 = vector.load %arg4[%c0_4, %c0_5] : memref<8x128xf32, #tpu.memory_space<vmem>>, vector<8x128xf32>
    tpu.vector_store %arg4[%c0_4, %c0_5], %5 {strides = array<i32>} : memref<8x128xf32, #tpu.memory_space<vmem>>, vector<8x128xf32>,
    %c0_6 = arith.constant 0 : index
    %c0_7 = arith.constant 0 : index
    %7 = vector.load %arg5[%c0_6, %c0_7] : memref<8x128xf32, #tpu.memory_space<vmem>>, vector<8x128xf32>
    %8 = arith.addf %7, %3 : vector<8x128xf32>
    %c0_8 = arith.constant 0 : index
    %c0_9 = arith.constant 0 : index
    %9 = vector.load %arg5[%c0_8, %c0_9] : memref<8x128xf32, #tpu.memory_space<vmem>>, vector<8x128xf32>
    tpu.vector_store %arg5[%c0_8, %c0_9], %8 {strides = array<i32>} : memref<8x128xf32, #tpu.memory_space<vmem>>, vector<8x128xf32>,
    %c0_10 = arith.constant 0 : index
    %c128 = arith.constant 128 : index
    %10 = vector.load %arg2[%c0_10, %c128] : memref<8x256xf32, #tpu.memory_space<vmem>>, vector<8x128xf32>
    %c0_11 = arith.constant 0 : index
    %c0_12 = arith.constant 0 : index
    %11 = vector.load %arg4[%c0_11, %c0_12] : memref<8x128xf32, #tpu.memory_space<vmem>>, vector<8x128xf32>
    %12 = arith.maximumf %11, %10 : vector<8x128xf32>
    %c0_13 = arith.constant 0 : index
    %c0_14 = arith.constant 0 : index
    %13 = vector.load %arg4[%c0_13, %c0_14] : memref<8x128xf32, #tpu.memory_space<vmem>>, vector<8x128xf32>
    tpu.vector_store %arg4[%c0_13, %c0_14], %12 {strides = array<i32>} : memref<8x128xf32, #tpu.memory_space<vmem>>, vector<8x128xf32>,
    %c0_15 = arith.constant 0 : index
    %c0_16 = arith.constant 0 : index
    %14 = vector.load %arg5[%c0_15, %c0_16] : memref<8x128xf32, #tpu.memory_space<vmem>>, vector<8x128xf32>
    %15 = arith.addf %14, %10 : vector<8x128xf32>
    %c0_17 = arith.constant 0 : index
    %c0_18 = arith.constant 0 : index
    %16 = vector.load %arg5[%c0_17, %c0_18] : memref<8x128xf32, #tpu.memory_space<vmem>>, vector<8x128xf32>
    tpu.vector_store %arg5[%c0_17, %c0_18], %15 {strides = array<i32>} : memref<8x128xf32, #tpu.memory_space<vmem>>, vector<8x128xf32>,
    %c0_i32_19 = arith.constant 0 : i32
    %17 = arith.cmpi eq, %arg1, %c0_i32_19 : i32
    %18 = arith.extui %17 : i1 to i32
    %c0_i32_20 = arith.constant 0 : i32
    %19 = arith.cmpi ne, %18, %c0_i32_20 : i32
    scf.if %19 {
      %c0_21 = arith.constant 0 : index
      %c0_22 = arith.constant 0 : index
      %20 = vector.load %arg4[%c0_21, %c0_22] : memref<8x128xf32, #tpu.memory_space<vmem>>, vector<8x128xf32>
      %cst = arith.constant dense<0xFF800000> : vector<8xf32>
      %21 = vector.multi_reduction <maximumf>, %20, %cst [1] : vector<8x128xf32> to vector<8xf32>
      %22 = vector.shape_cast %21 : vector<8xf32> to vector<8x1xf32>
      %c0_23 = arith.constant 0 : index
      %c0_24 = arith.constant 0 : index
      %23 = vector.load %arg5[%c0_23, %c0_24] : memref<8x128xf32, #tpu.memory_space<vmem>>, vector<8x128xf32>
      %cst_25 = arith.constant dense<0.000000e+00> : vector<8xf32>
      %24 = vector.multi_reduction <add>, %23, %cst_25 [1] : vector<8x128xf32> to vector<8xf32>
      %25 = vector.shape_cast %24 : vector<8xf32> to vector<8x1xf32>
      %cst_26 = arith.constant 3.906250e-03 : f32
      %26 = vector.broadcast %cst_26 : f32 to vector<8x1xf32>
      %27 = arith.mulf %25, %26 : vector<8x1xf32>
      %c0_27 = arith.constant 0 : index
      %c0_28 = arith.constant 0 : index
      %28 = vector.load %arg3[%c0_27, %c0_28] : memref<8x2xf32, #tpu.memory_space<vmem>>, vector<8x1xf32>
      tpu.vector_store %arg3[%c0_27, %c0_28], %22 {strides = array<i32>} : memref<8x2xf32, #tpu.memory_space<vmem>>, vector<8x1xf32>,
      %c0_29 = arith.constant 0 : index
      %c1 = arith.constant 1 : index
      %29 = vector.load %arg3[%c0_29, %c1] : memref<8x2xf32, #tpu.memory_space<vmem>>, vector<8x1xf32>
      tpu.vector_store %arg3[%c0_29, %c1], %27 {strides = array<i32>} : memref<8x2xf32, #tpu.memory_space<vmem>>, vector<8x1xf32>,
    } else {
    }
    return
  }
  func.func @transform_0(%arg0: i32, %arg1: i32) -> (i32, i32) {
    %c0_i32 = arith.constant 0 : i32
    return %arg0, %arg1 : i32, i32
  }
  func.func @transform_1(%arg0: i32, %arg1: i32) -> (i32, i32) {
    %c0_i32 = arith.constant 0 : i32
    %c0_i32_0 = arith.constant 0 : i32
    return %arg0, %c0_i32 : i32, i32
  }
}

</mosaic_0001>

<bundles_post_ra>
// kernel: tpu_custom_call.1
= control target key start
LH: loop header
LB: loop body
LE: loop exit
PB: predicated region body
PF: predicated region fallthrough
CT: control target
= control target key end

     0   :  { %6 = vsyncpa [#allocation5], 0  ;;  %s82_s6 = smov [#allocation4]   ;;  %s102_s0 = inlined_call_operand.hbm [shape: f32[8,256], index: 0, kind: input, shape index: {}]   ;;  %s103_s1 = inlined_call_operand.vmem [shape: f32[8,2], index: 1, kind: output, shape index: {}]  }
   0x1   :  { %s13_s7 = sshll.u32 %s82_s6, 4  ;;  %s14_s7 = int_to_ptr.vmem [resolvable:$true] %s13_s7 }
   0x2   :  { %s68_s8 = scalar_lea.vmem %s14_s7, 256  ;;  %p73_p1 = scmp.lt.s32.totalorder %s14_s7, %s14_s7 }
   0x3   :  { %p69_p0 = scmp.ne.s32.totalorder %s14_s7, %s68_s8  ;;  %p74_p2 = scmp.lt.s32.totalorder %s68_s8, %s68_s8 }
   0x5   :  { %p75_p3 = por %p74_p2, %p73_p1 }
   0x7   :  { %p76_p4 = pnand %p75_p3, %p69_p0 }
   0x9   :  { %79 = shalt.err (!%p76_p4)
}
   0xa   :  { %16 = dma.hbm_to_vmem [thread:$0]  %s102_s0, 256, %s14_s7, [#allocation5]  }
   0xb   :  { %80 = dma.done.wait [#allocation5], 256  }
   0xc   :  { %81 = vsyncadd [#allocation5], 4294967040  ;;  %v26_v0 = vld [vmem:[#allocation4] sm:$0xff]  ;;  %v33_v1 = vld [vmem:[#allocation4 + $0x8] sm:$0xff]  ;;  %vm50_vm0 = vcmask 7168   ;;  %vm52_vm1 = vcmask 15368  }
   0xd   :  { %v38_v2 = vadd.f32 %v33_v1, %v26_v0  ;;  %v35_v3 = vmax.f32 %v26_v0, %v33_v1 }
   0xf   :  { %47 = vadd.xlane.f32.xlu0 %v38_v2 }
  0x13   :  { %44 = vmax.xlane.f32.xlu0 %v35_v3 }
  0x98   :  { %v48_v4 = vpop.xlane.xlu0 %47 }
  0x99   :  { %v49_v5 = vmul.f32 0.00390625, %v48_v4 }
  0x9c   :  { %v45_v6 = vpop.xlane.xlu0 %44 }
  0x9d   :  { %51 = vst.msk [vmem:[%s103_s1] sm:$0xff] %vm50_vm0, %v45_v6 }
  0x9e   :  { %53 = vst.msk [vmem:[%s103_s1] sm:$0xff] %vm52_vm1, %v49_v5 }
  0x9f   :  { %58 = vsyncpa [#allocation5], 1 }

</bundles_post_ra>
